<compile_context>
chip_gen: v5e
topology: v5e:2x2
jax: 0.10.0
libtpu: 0.0.40
codegen_flags: <defaults>
</compile_context>

<pallas_src>
import functools

import jax
import jax.numpy as jnp
from jax.experimental import pallas as pl
from jax.experimental.pallas import tpu as pltpu


def _round_up(x: int, m: int) -> int:
    return ((x + m - 1) // m) * m


# ---------------------------------------------------------------------------
# Kernel
# ---------------------------------------------------------------------------
def mlp_kernel(x_ref, w1_ref, b1_ref, w2_ref, b2_ref, w3_ref, b3_ref, o_ref):
    # Cast the activation tile in-kernel (free on the VPU); weights are bf16.
    x = x_ref[...].astype(w1_ref.dtype)
    # fc_in + ReLU   (bf16 operands, f32 MXU accumulation, f32 bias add)
    h1 = jnp.dot(x, w1_ref[...], preferred_element_type=jnp.float32)
    h1 = jnp.maximum(h1 + b1_ref[...], 0.0).astype(w2_ref.dtype)
    # fc_h1 + tanh   (tanh on the EUP, f32)
    h2 = jnp.dot(h1, w2_ref[...], preferred_element_type=jnp.float32)
    h2 = jnp.tanh(h2 + b2_ref[...]).astype(w3_ref.dtype)
    # fc_out (output lane-padded to a multiple of 128; wrapper slices real cols)
    out = jnp.dot(h2, w3_ref[...], preferred_element_type=jnp.float32)
    o_ref[...] = (out + b3_ref[...]).astype(o_ref.dtype)


# ---------------------------------------------------------------------------
# One-time parameter preparation (hoisted out of the per-call forward)
# ---------------------------------------------------------------------------
def prepare_params(w1, b1, w2, b2, w3, b3, *, compute_dtype=jnp.bfloat16,
                   pad_hidden=True):
    """Weights in (in_features, out_features) layout (transposed vs PyTorch's
    nn.Linear.weight); biases in (1, out_features).

    - Zero-pads hidden dims and the output dim to multiples of 128 so every
      intermediate vreg is lane-dense and output stores are unmasked.
    - Casts weights to bf16 (MXU operands); keeps biases f32 (added to the
      f32 accumulator).
    Run once at init so the forward pass contains no per-call cast/pad ops.
    """
    in_size, h1 = w1.shape
    h2 = w2.shape[1]
    out_size = w3.shape[1]

    h1p = _round_up(max(h1, 128), 128) if pad_hidden else h1
    h2p = _round_up(max(h2, 128), 128) if pad_hidden else h2
    outp = _round_up(max(out_size, 128), 128)

    def pad2(a, rows, cols):
        return jnp.pad(a, ((0, rows - a.shape[0]), (0, cols - a.shape[1])))

    # Zero padding is exact: padded h1 cols = relu(0+0) = 0, padded w2 rows are
    # 0; padded h2 cols = tanh(0+0) = 0, padded w3 rows are 0.
    w1p = pad2(w1, in_size, h1p).astype(compute_dtype)
    b1p = pad2(b1, 1, h1p).astype(jnp.float32)
    w2p = pad2(w2, h1p, h2p).astype(compute_dtype)
    b2p = pad2(b2, 1, h2p).astype(jnp.float32)
    w3p = pad2(w3, h2p, outp).astype(compute_dtype)
    b3p = pad2(b3, 1, outp).astype(jnp.float32)
    return (w1p, b1p, w2p, b2p, w3p, b3p)


def _choose_batch_tile(batch: int, cap: int = 1024) -> int:
    """Batch tile: multiple of 8, <= cap rows, padding-aware. For large
    batches force >=2 grid steps so the 'parallel' axis can shard across
    v7x's two TensorCores; tiny batches get a single tile (no overhead)."""
    if batch <= 256:
        return _round_up(batch, 8)
    n_tiles = max(2, pl.cdiv(batch, cap))
    return _round_up(pl.cdiv(batch, n_tiles), 8)


# ---------------------------------------------------------------------------
# Forward pass (expects prepared params)
# ---------------------------------------------------------------------------
def nn_forward(x, w1, b1, w2, b2, w3, b3, *, out_size,
               out_dtype=jnp.bfloat16):
    """Fused MLP forward. x: (batch, in_size), any float dtype. Params from
    prepare_params(). Returns (batch, out_size) in out_dtype.
    Note: pass out_dtype=jnp.float32 if full Q-value precision is required;
    the bf16 default halves the dominant (lane-padded) output writeback."""
    batch, in_size = x.shape
    h1p = w1.shape[1]
    h2p = w2.shape[1]
    outp = w3.shape[1]

    tb = _choose_batch_tile(batch)
    n_tiles = pl.cdiv(batch, tb)

    resident = lambda shape: pl.BlockSpec(shape, lambda i: (0, 0))

    cost = pl.CostEstimate(
        flops=2 * batch * (in_size * h1p + h1p * h2p + h2p * outp),
        transcendentals=batch * h2p,  # tanh
        bytes_accessed=(
            x.size * x.dtype.itemsize
            + sum(a.size * a.dtype.itemsize for a in (w1, b1, w2, b2, w3, b3))
            + batch * outp * jnp.dtype(out_dtype).itemsize
        ),
    )

    out = pl.pallas_call(
        mlp_kernel,
        out_shape=jax.ShapeDtypeStruct((batch, outp), out_dtype),
        grid=(n_tiles,),
        in_specs=[
            pl.BlockSpec((tb, in_size), lambda i: (i, 0)),   # batch-tiled x
            resident(w1.shape), resident(b1.shape),          # weights/biases
            resident(w2.shape), resident(b2.shape),          # stay resident
            resident(w3.shape), resident(b3.shape),          # across grid steps
        ],
        out_specs=pl.BlockSpec((tb, outp), lambda i: (i, 0)),
        compiler_params=pltpu.CompilerParams(
            dimension_semantics=("parallel",),
        ),
        cost_estimate=cost,
    )(x, w1, b1, w2, b2, w3, b3)

    return out[:, :out_size]


# ---------------------------------------------------------------------------
# Init / reference
# ---------------------------------------------------------------------------
def init_linear(key, fan_in, fan_out):
    """PyTorch nn.Linear default init: U(-1/sqrt(fan_in), 1/sqrt(fan_in)).
    Weight returned in (fan_in, fan_out) layout, bias in (1, fan_out)."""
    kw, kb = jax.random.split(key)
    bound = 1.0 / jnp.sqrt(jnp.float32(fan_in))
    w = jax.random.uniform(kw, (fan_in, fan_out), jnp.float32, -bound, bound)
    b = jax.random.uniform(kb, (1, fan_out), jnp.float32, -bound, bound)
    return w, b


def reference_forward(x, w1, b1, w2, b2, w3, b3):
    h1 = jnp.maximum(x @ w1 + b1, 0.0)
    h2 = jnp.tanh(h1 @ w2 + b2)
    return h2 @ w3 + b3


if __name__ == "__main__":
    # DQN-style sizes: input_size=16, hidden1=32, hidden2=32, output=4, batch=8
    batch, input_size, hidden1, hidden2, output_size = 8, 16, 32, 32, 4

    key = jax.random.PRNGKey(0)
    kx, k1, k2, k3 = jax.random.split(key, 4)

    x = jax.random.normal(kx, (batch, input_size), jnp.float32)
    w1, b1 = init_linear(k1, input_size, hidden1)
    w2, b2 = init_linear(k2, hidden1, hidden2)
    w3, b3 = init_linear(k3, hidden2, output_size)

    # One-time param prep (bf16 cast + 128-lane padding), then a fused forward.
    params = prepare_params(w1, b1, w2, b2, w3, b3)
    fwd = jax.jit(functools.partial(nn_forward, out_size=output_size))
    out = jax.block_until_ready(fwd(x, *params))

    ref = reference_forward(x, w1, b1, w2, b2, w3, b3)
    assert out.shape == (batch, output_size)
    out_f32 = out.astype(jnp.float32)
    # bf16 operands / bf16 output with f32 accumulation -> loosened tolerance.
    assert jnp.allclose(out_f32, ref, atol=5e-2, rtol=5e-2), (
        f"max abs err {jnp.max(jnp.abs(out_f32 - ref))}"
    )

    print("KERNEL_OK")
</pallas_src>

<mosaic_0001>
module attributes {stable_mosaic.version = 11 : i64} {
  func.func @mlp_kernel(%arg0: i32, %arg1: memref<8x16xf32, #tpu.memory_space<vmem>>, %arg2: memref<16x128xbf16, #tpu.memory_space<vmem>>, %arg3: memref<1x128xf32, #tpu.memory_space<vmem>>, %arg4: memref<128x128xbf16, #tpu.memory_space<vmem>>, %arg5: memref<1x128xf32, #tpu.memory_space<vmem>>, %arg6: memref<128x128xbf16, #tpu.memory_space<vmem>>, %arg7: memref<1x128xf32, #tpu.memory_space<vmem>>, %arg8: memref<8x128xbf16, #tpu.memory_space<vmem>>) attributes {dimension_semantics = [#tpu.dimension_semantics<parallel>], iteration_bounds = array<i64: 1>, scalar_prefetch = 0 : i64, scratch_operands = 0 : i64, tpu.core_type = #tpu.core_type<tc>, window_params = [{transform_indices = @transform_0, window_bounds = array<i64: 8, 16>}, {pipeline_mode = #tpu.pipeline_mode<synchronous>, transform_indices = @transform_1, window_bounds = array<i64: 16, 128>}, {pipeline_mode = #tpu.pipeline_mode<synchronous>, transform_indices = @transform_2, window_bounds = array<i64: 1, 128>}, {pipeline_mode = #tpu.pipeline_mode<synchronous>, transform_indices = @transform_3, window_bounds = array<i64: 128, 128>}, {pipeline_mode = #tpu.pipeline_mode<synchronous>, transform_indices = @transform_4, window_bounds = array<i64: 1, 128>}, {pipeline_mode = #tpu.pipeline_mode<synchronous>, transform_indices = @transform_5, window_bounds = array<i64: 128, 128>}, {pipeline_mode = #tpu.pipeline_mode<synchronous>, transform_indices = @transform_6, window_bounds = array<i64: 1, 128>}, {transform_indices = @transform_7, window_bounds = array<i64: 8, 128>}]} {
    %c0 = arith.constant 0 : index
    %c0_0 = arith.constant 0 : index
    %0 = vector.load %arg1[%c0, %c0_0] : memref<8x16xf32, #tpu.memory_space<vmem>>, vector<8x16xf32>
    %1 = arith.truncf %0 : vector<8x16xf32> to vector<8x16xbf16>
    %c0_1 = arith.constant 0 : index
    %c0_2 = arith.constant 0 : index
    %2 = vector.load %arg2[%c0_1, %c0_2] : memref<16x128xbf16, #tpu.memory_space<vmem>>, vector<16x128xbf16>
    %cst = arith.constant dense<0.000000e+00> : vector<8x128xf32>
    %3 = tpu.matmul %1, %2, %cst {dimension_numbers = #tpu.dot_dimension_numbers<[1], [0], [0], [1], [0, 0, 1, 1], [], []>} : vector<8x16xbf16>, vector<16x128xbf16>, vector<8x128xf32> -> vector<8x128xf32>
    %c0_3 = arith.constant 0 : index
    %c0_4 = arith.constant 0 : index
    %4 = vector.load %arg3[%c0_3, %c0_4] : memref<1x128xf32, #tpu.memory_space<vmem>>, vector<1x128xf32>
    %5 = vector.broadcast %4 : vector<1x128xf32> to vector<8x128xf32>
    %6 = arith.addf %3, %5 : vector<8x128xf32>
    %cst_5 = arith.constant 0.000000e+00 : f32
    %7 = vector.broadcast %cst_5 : f32 to vector<8x128xf32>
    %8 = arith.maximumf %6, %7 : vector<8x128xf32>
    %9 = arith.truncf %8 : vector<8x128xf32> to vector<8x128xbf16>
    %c0_6 = arith.constant 0 : index
    %c0_7 = arith.constant 0 : index
    %10 = vector.load %arg4[%c0_6, %c0_7] : memref<128x128xbf16, #tpu.memory_space<vmem>>, vector<128x128xbf16>
    %cst_8 = arith.constant dense<0.000000e+00> : vector<8x128xf32>
    %11 = tpu.matmul %9, %10, %cst_8 {dimension_numbers = #tpu.dot_dimension_numbers<[1], [0], [0], [1], [0, 0, 1, 1], [], []>} : vector<8x128xbf16>, vector<128x128xbf16>, vector<8x128xf32> -> vector<8x128xf32>
    %c0_9 = arith.constant 0 : index
    %c0_10 = arith.constant 0 : index
    %12 = vector.load %arg5[%c0_9, %c0_10] : memref<1x128xf32, #tpu.memory_space<vmem>>, vector<1x128xf32>
    %13 = vector.broadcast %12 : vector<1x128xf32> to vector<8x128xf32>
    %14 = arith.addf %11, %13 : vector<8x128xf32>
    %15 = math.tanh %14 : vector<8x128xf32>
    %16 = arith.truncf %15 : vector<8x128xf32> to vector<8x128xbf16>
    %c0_11 = arith.constant 0 : index
    %c0_12 = arith.constant 0 : index
    %17 = vector.load %arg6[%c0_11, %c0_12] : memref<128x128xbf16, #tpu.memory_space<vmem>>, vector<128x128xbf16>
    %cst_13 = arith.constant dense<0.000000e+00> : vector<8x128xf32>
    %18 = tpu.matmul %16, %17, %cst_13 {dimension_numbers = #tpu.dot_dimension_numbers<[1], [0], [0], [1], [0, 0, 1, 1], [], []>} : vector<8x128xbf16>, vector<128x128xbf16>, vector<8x128xf32> -> vector<8x128xf32>
    %c0_14 = arith.constant 0 : index
    %c0_15 = arith.constant 0 : index
    %19 = vector.load %arg7[%c0_14, %c0_15] : memref<1x128xf32, #tpu.memory_space<vmem>>, vector<1x128xf32>
    %20 = vector.broadcast %19 : vector<1x128xf32> to vector<8x128xf32>
    %21 = arith.addf %18, %20 : vector<8x128xf32>
    %22 = arith.truncf %21 : vector<8x128xf32> to vector<8x128xbf16>
    %c0_16 = arith.constant 0 : index
    %c0_17 = arith.constant 0 : index
    %23 = vector.load %arg8[%c0_16, %c0_17] : memref<8x128xbf16, #tpu.memory_space<vmem>>, vector<8x128xbf16>
    tpu.vector_store %arg8[%c0_16, %c0_17], %22 {strides = array<i32>} : memref<8x128xbf16, #tpu.memory_space<vmem>>, vector<8x128xbf16>,
    return
  }
  func.func @transform_0(%arg0: i32) -> (i32, i32) {
    %c0_i32 = arith.constant 0 : i32
    %c0_i32_0 = arith.constant 0 : i32
    return %arg0, %c0_i32 : i32, i32
  }
  func.func @transform_1(%arg0: i32) -> (i32, i32) {
    %c0_i32 = arith.constant 0 : i32
    %c0_i32_0 = arith.constant 0 : i32
    %c0_i32_1 = arith.constant 0 : i32
    return %c0_i32, %c0_i32_0 : i32, i32
  }
  func.func @transform_2(%arg0: i32) -> (i32, i32) {
    %c0_i32 = arith.constant 0 : i32
    %c0_i32_0 = arith.constant 0 : i32
    %c0_i32_1 = arith.constant 0 : i32
    return %c0_i32, %c0_i32_0 : i32, i32
  }
  func.func @transform_3(%arg0: i32) -> (i32, i32) {
    %c0_i32 = arith.constant 0 : i32
    %c0_i32_0 = arith.constant 0 : i32
    %c0_i32_1 = arith.constant 0 : i32
    return %c0_i32, %c0_i32_0 : i32, i32
  }
  func.func @transform_4(%arg0: i32) -> (i32, i32) {
    %c0_i32 = arith.constant 0 : i32
    %c0_i32_0 = arith.constant 0 : i32
    %c0_i32_1 = arith.constant 0 : i32
    return %c0_i32, %c0_i32_0 : i32, i32
  }
  func.func @transform_5(%arg0: i32) -> (i32, i32) {
    %c0_i32 = arith.constant 0 : i32
    %c0_i32_0 = arith.constant 0 : i32
    %c0_i32_1 = arith.constant 0 : i32
    return %c0_i32, %c0_i32_0 : i32, i32
  }
  func.func @transform_6(%arg0: i32) -> (i32, i32) {
    %c0_i32 = arith.constant 0 : i32
    %c0_i32_0 = arith.constant 0 : i32
    %c0_i32_1 = arith.constant 0 : i32
    return %c0_i32, %c0_i32_0 : i32, i32
  }
  func.func @transform_7(%arg0: i32) -> (i32, i32) {
    %c0_i32 = arith.constant 0 : i32
    %c0_i32_0 = arith.constant 0 : i32
    return %arg0, %c0_i32 : i32, i32
  }
}

</mosaic_0001>

<bundles_post_ra>
// kernel: nn_forward.1
= control target key start
LH: loop header
LB: loop body
LE: loop exit
PB: predicated region body
PF: predicated region fallthrough
CT: control target
= control target key end

     0   :  { %12 = vsyncpa [#allocation3], 0  ;;  %s563_s0 = inlined_call_operand.hbm [shape: f32[8,16], index: 0, kind: input, shape index: {}]   ;;  %s564_s1 = inlined_call_operand.hbm [shape: bf16[16,128], index: 1, kind: input, shape index: {}]   ;;  %s565_s2 = inlined_call_operand.vmem [shape: f32[1,128], index: 2, kind: input, shape index: {}]   ;;  %s566_s3 = inlined_call_operand.hbm [shape: bf16[128,128], index: 3, kind: input, shape index: {}]   ;;  %s567_s4 = inlined_call_operand.vmem [shape: f32[1,128], index: 4, kind: input, shape index: {}]   ;;  %s568_s5 = inlined_call_operand.hbm [shape: bf16[128,128], index: 5, kind: input, shape index: {}]   ;;  %s569_s6 = inlined_call_operand.vmem [shape: f32[1,128], index: 6, kind: input, shape index: {}]   ;;  %s570_s7 = inlined_call_operand.vmem [shape: bf16[8,128], index: 7, kind: output, shape index: {}]  }
   0x1   :  { %13 = vsyncpa [#allocation5], 0  ;;  %s30_s26 = sshll.u32 %s564_s1, 4  ;;  %s31_s26 = int_to_ptr.hbm [resolvable:$true] %s30_s26 }
   0x2   :  { %14 = vsyncpa [#allocation8], 0  ;;  %s493_s27 = smov [#allocation4]   ;;  %s20_s8 = sshll.u32 %s563_s0, 4  ;;  %s21_s8 = int_to_ptr.hbm [resolvable:$true] %s20_s8 }
   0x3   :  { %s32_s28 = sshll.u32 %s493_s27, 4  ;;  %s494_s9 = smov 64   ;;  %s33_s28 = int_to_ptr.vmem [resolvable:$true] %s32_s28 }
   0x4   :  { %s495_s10 = smov 4   ;;  %s496_s11 = smov [#allocation2]  }
   0x5   :  { %38 = dma.hbm_to_vmem [thread:$0]  %s31_s26, 128, %s33_s28, [#allocation5], %s494_s9, %s494_s9, %s495_s10  }
   0x6   :  { %s22_s12 = sshll.u32 %s496_s11, 4  ;;  %s45_s15 = sshll.u32 %s566_s3, 4  ;;  %s23_s12 = int_to_ptr.vmem [resolvable:$true] %s22_s12  ;;  %s46_s15 = int_to_ptr.hbm [resolvable:$true] %s45_s15 }
   0x7   :  { %25 = dma.hbm_to_vmem [thread:$0]  %s21_s8, 128, %s23_s12, [#allocation3]  }
   0x8   :  { %s60_s17 = sshll.u32 %s568_s5, 4  ;;  %s497_s18 = smov [#allocation6]   ;;  %s61_s17 = int_to_ptr.hbm [resolvable:$true] %s60_s17 }
   0x9   :  { %s47_s19 = sshll.u32 %s497_s18, 4  ;;  %s498_s0 = smov [#allocation7]   ;;  %s48_s19 = int_to_ptr.vmem [resolvable:$true] %s47_s19 }
   0xa   :  { %53 = dma.hbm_to_vmem [thread:$0]  %s46_s15, 1024, %s48_s19, [#allocation5], %s494_s9, %s494_s9, %s495_s10  }
   0xb   :  { %s62_s20 = sshll.u32 %s498_s0, 4  ;;  %s63_s20 = int_to_ptr.vmem [resolvable:$true] %s62_s20 }
   0xc   :  { %68 = dma.hbm_to_vmem [thread:$0]  %s61_s17, 1024, %s63_s20, [#allocation8], %s494_s9, %s494_s9, %s495_s10  }
   0xd   :  { %487 = dma.done.wait [#allocation3], 128  }
   0xe   :  { %488 = vsyncadd [#allocation3], 4294967168 }
   0xf   :  { %489 = dma.done.wait [#allocation5], 1152  }
  0x10   :  { %490 = vsyncadd [#allocation5], 4294966144 }
  0x11   :  { %491 = dma.done.wait [#allocation8], 1024  }
  0x12   :  { %492 = vsyncadd [#allocation8], 4294966272  ;;  %v363_v0 = vld [vmem:[#allocation4] sm:$0xff]  ;;  %v88_v1 = vld [vmem:[#allocation2] sm:$0xff]  ;;  %vm102_vm0 = vcmask 130048  }
  0x13   :  { %v371_v2 = vld [vmem:[#allocation6 + $0x38] sm:$0xff]  ;;  %v89_v3 = vpack.c.bf16 %v88_v1, %v88_v1  ;;  %113 = vmatpush.bf16.msra.mxu0 %v363_v0  ;;  %v370_v4 = vld [vmem:[#allocation6 + $0x30] sm:$0xff]  ;;  %v369_v5 = vld [vmem:[#allocation6 + $0x28] sm:$0xff] }
  0x14   :  { %189 = vmatpush.bf16.msra.mxu1 %v371_v2  ;;  %v368_v6 = vld [vmem:[#allocation6 + $0x20] sm:$0xff]  ;;  %v367_v7 = vld [vmem:[#allocation6 + $0x18] sm:$0xff]  ;;  %v366_v8 = vld [vmem:[#allocation6 + $0x10] sm:$0xff] }
  0x15   :  { %v365_v9 = vld [vmem:[#allocation6 + $0x8] sm:$0xff]  ;;  %v364_v10 = vld [vmem:[#allocation6] sm:$0xff]  ;;  %v379_v11 = vld [vmem:[#allocation7 + $0x38] sm:$0xff] }
  0x16   :  { %298 = vmatmul.msk.bf16.vlgmr.msra.gmra.mxu0 %vm102_vm0, %v89_v3  ;;  %272 = vmatpush.bf16.msra.mxu2 %v379_v11  ;;  %v378_v12 = vld [vmem:[#allocation7 + $0x30] sm:$0xff]  ;;  %v377_v13 = vld [vmem:[#allocation7 + $0x28] sm:$0xff]  ;;  %v376_v14 = vld [vmem:[#allocation7 + $0x20] sm:$0xff] }
  0x17   :  { %v375_v15 = vld [vmem:[#allocation7 + $0x18] sm:$0xff]  ;;  %v386_v16 = vld [vmem:[%s565_s2] ss:$0 sm:$0xff]  ;;  %v373_v23 = vld [vmem:[#allocation7 + $0x8] sm:$0xff] }
  0x18   :  { %190 = vmatpush.bf16.msra.mxu1 %v370_v4  ;;  %v374_v22 = vld [vmem:[#allocation7 + $0x10] sm:$0xff]  ;;  %v372_v24 = vld [vmem:[#allocation7] sm:$0xff] }
  0x19   :  { %v387_v25 = vld [vmem:[%s567_s4] ss:$0 sm:$0xff] }
  0x1a   :  { %273 = vmatpush.bf16.msra.mxu2 %v378_v12  ;;  %v388_v31 = vld [vmem:[%s569_s6] ss:$0 sm:$0xff] }
  0x1c   :  { %191 = vmatpush.bf16.msra.mxu1 %v369_v5 }
  0x1e   :  { %274 = vmatpush.bf16.msra.mxu2 %v377_v13 }
  0x20   :  { %192 = vmatpush.bf16.msra.mxu1 %v368_v6 }
  0x22   :  { %275 = vmatpush.bf16.msra.mxu2 %v376_v14 }
  0x24   :  { %193 = vmatpush.bf16.msra.mxu1 %v367_v7 }
  0x26   :  { %276 = vmatpush.bf16.msra.mxu2 %v375_v15 }
  0x28   :  { %194 = vmatpush.bf16.msra.mxu1 %v366_v8 }
  0x2a   :  { %277 = vmatpush.bf16.msra.mxu2 %v374_v22 }
  0x2c   :  { %195 = vmatpush.bf16.msra.mxu1 %v365_v9 }
  0x2e   :  { %278 = vmatpush.bf16.msra.mxu2 %v373_v23 }
  0x30   :  { %196 = vmatpush.bf16.msra.mxu1 %v364_v10 }
  0x32   :  { %279 = vmatpush.bf16.msra.mxu2 %v372_v24 }
  0x93   :  { %v115_v17 = vpop.f32.mrf.mxu0 }
  0x94   :  { %v116_v18 = vadd.f32 %v386_v16, %v115_v17 }
  0x96   :  { %v119_v19 = vmax.f32 %v116_v18, 0.0 }
  0x98   :  { %v120_v20 = vpack.c.bf16 %v119_v19, %v119_v19 }
  0x9a   :  { %197 = vmatmul.bf16.vlgmr.msra.gmra.mxu1 %v120_v20 }
  0x9b   :  { %v117_v21 = vpop.f32.mrf.mxu0 }
 0x117   :  { %v198_v26 = vpop.f32.mrf.mxu1 }
 0x118   :  { %v199_v27 = vadd.f32 %v387_v25, %v198_v26 }
 0x11a   :  { %389 = vtanh.f32 %v199_v27 }
 0x11f   :  { %v200_v28 = vpop.f32.mrf.mxu1 }
 0x120   :  { %v390_v29 = vpop.eup %389 }
 0x121   :  { %v203_v30 = vpack.c.bf16 %v390_v29, %v390_v29 }
 0x123   :  { %280 = vmatmul.bf16.vlgmr.msra.gmra.mxu2 %v203_v30 }
 0x1a6   :  { %v281_v32 = vpop.f32.mrf.mxu2 }
 0x1a7   :  { %v282_v33 = vadd.f32 %v388_v31, %v281_v32 }
 0x1a9   :  { %v285_v34 = vpack.c.bf16 %v282_v33, %v282_v33 }
 0x1ab   :  { %286 = vst [vmem:[%s570_s7] sm:$0xf] %v285_v34 }
 0x1ae   :  { %v283_v35 = vpop.f32.mrf.mxu2 }
 0x1af   :  { %291 = vsyncpa [#allocation3], 1 }
 0x1b0   :  { %292 = vsyncpa [#allocation5], 1 }
 0x1b1   :  { %293 = vsyncpa [#allocation8], 1 }

</bundles_post_ra>
